<compile_context>
chip_gen: v5e
topology: v5e:2x2
jax: 0.10.0
libtpu: 0.0.40
codegen_flags: <defaults>
</compile_context>

<pallas_src>
import jax
import jax.numpy as jnp
from jax.experimental import pallas as pl
from jax.experimental.pallas import tpu as pltpu

IN_FEATURES = 2048
NUM_CLASSES = 10
LANE = 128          # lane width (last-dim tile)
SUB_BF16 = 16       # bf16 sublane tile (second-to-last dim)
MAX_TB = 1024       # max batch rows per grid step (fits default scoped VMEM everywhere)


def _round_up(x, m):
    return ((x + m - 1) // m) * m


def _cdiv(a, b):
    return (a + b - 1) // b


def _fc_kernel(x_ref, w_ref, b_ref, o_ref):
    # x_ref: [TB, K]       bf16 activations (pipelined over the batch grid)
    # w_ref: [K, N_PAD]    bf16 packed weight, VMEM-resident (constant index_map)
    # b_ref: [1, N_PAD]    f32 packed bias,    VMEM-resident
    # o_ref: [TB, N_PAD]   f32 logits tile (lane-dense: N_PAD = multiple of 128)
    acc = jnp.dot(x_ref[...], w_ref[...], preferred_element_type=jnp.float32)
    o_ref[...] = acc + b_ref[...]


def pack_params(weight, bias):
    """One-time packing -- call at param-init/caching time, NOT per forward.

    weight: [N, K] f32 (torch nn.Linear layout), bias: [N] f32
    returns (w_packed [K, N_PAD] bf16, b_packed [1, N_PAD] f32),
    N_PAD = round_up(N, 128) so the kernel output is lane-dense.
    """
    n, k = weight.shape
    assert k == IN_FEATURES and bias.shape == (n,)
    n_pad = _round_up(n, LANE)
    w_packed = jnp.pad(weight.T, ((0, 0), (0, n_pad - n))).astype(jnp.bfloat16)  # [K, N_PAD]
    b_packed = jnp.pad(bias, (0, n_pad - n)).reshape(1, n_pad).astype(jnp.float32)
    return w_packed, b_packed


def resnet50_classifier_forward(feat, w_packed, b_packed,
                                num_classes=NUM_CLASSES, max_tb=MAX_TB):
    """feat: [B, 2048] (any float dtype; streamed as bf16).
    (w_packed, b_packed) from pack_params.
    Returns logits [B, num_classes] == torch nn.Linear(2048, num_classes)(feat)."""
    b_rows, k = feat.shape
    k_w, n_pad = w_packed.shape
    assert k == IN_FEATURES and k_w == IN_FEATURES
    assert b_packed.shape == (1, n_pad)
    assert num_classes <= n_pad

    # bf16 activations: halves the dominant HBM read (kernel is memory-bound).
    if feat.dtype != jnp.bfloat16:
        feat = feat.astype(jnp.bfloat16)

    # Balanced batch tiling (avoid up-to-a-tile padding waste), tb multiple of 16
    # for the bf16 (16,128) tile; guarantee >= 2 tiles when possible so the
    # "parallel" axis actually shards across v7x's two TensorCores.
    b_pad = _round_up(b_rows, SUB_BF16)
    n_tiles = _cdiv(b_pad, max_tb)
    if n_tiles == 1 and b_pad >= 2 * SUB_BF16:
        n_tiles = 2
    tb = _round_up(_cdiv(b_pad, n_tiles), SUB_BF16)
    b_full = n_tiles * tb
    if b_full != b_rows:
        feat = jnp.pad(feat, ((0, b_full - b_rows), (0, 0)))

    out = pl.pallas_call(
        _fc_kernel,
        out_shape=jax.ShapeDtypeStruct((b_full, n_pad), jnp.float32),
        grid_spec=pltpu.PrefetchScalarGridSpec(
            num_scalar_prefetch=0,
            grid=(n_tiles,),
            in_specs=[
                pl.BlockSpec((tb, k), lambda i: (i, 0)),       # activations: tiled over batch
                pl.BlockSpec((k, n_pad), lambda i: (0, 0)),    # weight: VMEM-resident
                pl.BlockSpec((1, n_pad), lambda i: (0, 0)),    # bias:   VMEM-resident
            ],
            out_specs=pl.BlockSpec((tb, n_pad), lambda i: (i, 0)),
        ),
        compiler_params=pltpu.CompilerParams(
            dimension_semantics=("parallel",),                 # megacore / 2-TC sharding
        ),
    )(feat, w_packed, b_packed)

    return out[:b_rows, :num_classes]


if __name__ == "__main__":
    key = jax.random.PRNGKey(0)
    k_feat, kw, kb = jax.random.split(key, 3)

    batch = 2
    feat = jax.random.normal(k_feat, (batch, IN_FEATURES), dtype=jnp.float32)

    # Module init: weight ~ N(0, 0.005); bias = torch Linear default U(+-1/sqrt(fan_in)).
    weight = 0.005 * jax.random.normal(kw, (NUM_CLASSES, IN_FEATURES), dtype=jnp.float32)
    bound = 1.0 / (IN_FEATURES ** 0.5)
    bias = jax.random.uniform(kb, (NUM_CLASSES,), minval=-bound, maxval=bound,
                              dtype=jnp.float32)

    # One-time packing, kept out of the per-call path.
    w_packed, b_packed = jax.block_until_ready(pack_params(weight, bias))

    logits = resnet50_classifier_forward(feat, w_packed, b_packed)
    jax.block_until_ready(logits)
    assert logits.shape == (batch, NUM_CLASSES)

    # Reference 1: same bf16 quantization of inputs/weight, f32 accumulation -> tight match.
    feat_q = feat.astype(jnp.bfloat16).astype(jnp.float32)
    w_q = weight.astype(jnp.bfloat16).astype(jnp.float32)
    ref_q = feat_q @ w_q.T + bias
    assert jnp.allclose(logits, ref_q, atol=1e-4, rtol=1e-4)

    # Reference 2: full-f32 torch-equivalent reference -> loose tolerance (bf16 streaming).
    ref_f32 = feat @ weight.T + bias
    assert jnp.allclose(logits, ref_f32, atol=5e-2, rtol=5e-2)

    print("KERNEL_OK")
</pallas_src>

<mosaic_0001>
module attributes {stable_mosaic.version = 11 : i64} {
  func.func @_fc_kernel(%arg0: i32, %arg1: memref<16x2048xbf16, #tpu.memory_space<vmem>>, %arg2: memref<2048x128xbf16, #tpu.memory_space<vmem>>, %arg3: memref<1x128xf32, #tpu.memory_space<vmem>>, %arg4: memref<16x128xf32, #tpu.memory_space<vmem>>) attributes {dimension_semantics = [#tpu.dimension_semantics<parallel>], iteration_bounds = array<i64: 1>, scalar_prefetch = 0 : i64, scratch_operands = 0 : i64, tpu.core_type = #tpu.core_type<tc>, window_params = [{transform_indices = @transform_0, window_bounds = array<i64: 16, 2048>}, {pipeline_mode = #tpu.pipeline_mode<synchronous>, transform_indices = @transform_1, window_bounds = array<i64: 2048, 128>}, {pipeline_mode = #tpu.pipeline_mode<synchronous>, transform_indices = @transform_2, window_bounds = array<i64: 1, 128>}, {transform_indices = @transform_3, window_bounds = array<i64: 16, 128>}]} {
    %c0 = arith.constant 0 : index
    %c0_0 = arith.constant 0 : index
    %0 = vector.load %arg1[%c0, %c0_0] : memref<16x2048xbf16, #tpu.memory_space<vmem>>, vector<16x2048xbf16>
    %c0_1 = arith.constant 0 : index
    %c0_2 = arith.constant 0 : index
    %1 = vector.load %arg2[%c0_1, %c0_2] : memref<2048x128xbf16, #tpu.memory_space<vmem>>, vector<2048x128xbf16>
    %cst = arith.constant dense<0.000000e+00> : vector<16x128xf32>
    %2 = tpu.matmul %0, %1, %cst {dimension_numbers = #tpu.dot_dimension_numbers<[1], [0], [0], [1], [0, 0, 1, 1], [], []>} : vector<16x2048xbf16>, vector<2048x128xbf16>, vector<16x128xf32> -> vector<16x128xf32>
    %c0_3 = arith.constant 0 : index
    %c0_4 = arith.constant 0 : index
    %3 = vector.load %arg3[%c0_3, %c0_4] : memref<1x128xf32, #tpu.memory_space<vmem>>, vector<1x128xf32>
    %4 = vector.broadcast %3 : vector<1x128xf32> to vector<16x128xf32>
    %5 = arith.addf %2, %4 : vector<16x128xf32>
    %c0_5 = arith.constant 0 : index
    %c0_6 = arith.constant 0 : index
    %6 = vector.load %arg4[%c0_5, %c0_6] : memref<16x128xf32, #tpu.memory_space<vmem>>, vector<16x128xf32>
    tpu.vector_store %arg4[%c0_5, %c0_6], %5 {strides = array<i32>} : memref<16x128xf32, #tpu.memory_space<vmem>>, vector<16x128xf32>,
    return
  }
  func.func @transform_0(%arg0: i32) -> (i32, i32) {
    %c0_i32 = arith.constant 0 : i32
    %c0_i32_0 = arith.constant 0 : i32
    return %arg0, %c0_i32 : i32, i32
  }
  func.func @transform_1(%arg0: i32) -> (i32, i32) {
    %c0_i32 = arith.constant 0 : i32
    %c0_i32_0 = arith.constant 0 : i32
    %c0_i32_1 = arith.constant 0 : i32
    return %c0_i32, %c0_i32_0 : i32, i32
  }
  func.func @transform_2(%arg0: i32) -> (i32, i32) {
    %c0_i32 = arith.constant 0 : i32
    %c0_i32_0 = arith.constant 0 : i32
    %c0_i32_1 = arith.constant 0 : i32
    return %c0_i32, %c0_i32_0 : i32, i32
  }
  func.func @transform_3(%arg0: i32) -> (i32, i32) {
    %c0_i32 = arith.constant 0 : i32
    %c0_i32_0 = arith.constant 0 : i32
    return %arg0, %c0_i32 : i32, i32
  }
}

</mosaic_0001>

<bundles_post_ra>
// kernel: tpu_custom_call.1
= control target key start
LH: loop header
LB: loop body
LE: loop exit
PB: predicated region body
PF: predicated region fallthrough
CT: control target
= control target key end

     0   :  { %8 = vsyncpa [#allocation3], 0  ;;  %s2264_s0 = inlined_call_operand.hbm [shape: bf16[16,2048], index: 0, kind: input, shape index: {}]   ;;  %s2265_s1 = inlined_call_operand.hbm [shape: bf16[2048,128], index: 1, kind: input, shape index: {}]   ;;  %s2266_s2 = inlined_call_operand.vmem [shape: f32[1,128], index: 2, kind: input, shape index: {}]   ;;  %s2267_s3 = inlined_call_operand.hbm [shape: f32[16,128], index: 3, kind: output, shape index: {}]  }
   0x1   :  { %9 = vsyncpa [#allocation6], 0 }
   0x2   :  { %10 = vsyncpa [#allocation4], 0  ;;  %s15_s14 = sshll.u32 %s2264_s0, 4  ;;  %s2224_s15 = smov [#allocation2]   ;;  %s16_s14 = int_to_ptr.hbm [resolvable:$true] %s15_s14 }
   0x3   :  { %s17_s16 = sshll.u32 %s2224_s15, 4  ;;  %s28_s19 = sshll.u32 %s2265_s1, 4  ;;  %s18_s16 = int_to_ptr.vmem [resolvable:$true] %s17_s16  ;;  %s29_s19 = int_to_ptr.hbm [resolvable:$true] %s28_s19 }
   0x4   :  { %s2225_s20 = smov 1024   ;;  %s2226_s21 = smov 64  }
   0x5   :  { %23 = dma.hbm_to_vmem [thread:$0]  %s16_s14, 2048, %s18_s16, [#allocation3], %s2225_s20, %s2225_s20, %s2226_s21  }
   0x6   :  { %s2227_s22 = smov [#allocation5]   ;;  %s2228_s24 = smov 4  }
   0x7   :  { %s30_s23 = sshll.u32 %s2227_s22, 4  ;;  %s31_s23 = int_to_ptr.vmem [resolvable:$true] %s30_s23 }
   0x8   :  { %36 = dma.hbm_to_vmem [thread:$0]  %s29_s19, 16384, %s31_s23, [#allocation6], %s2226_s21, %s2226_s21, %s2228_s24  }
   0x9   :  { %2218 = dma.done.wait [#allocation3], 2048  }
   0xa   :  { %2219 = vsyncadd [#allocation3], 4294965248 }
   0xb   :  { %2220 = dma.done.wait [#allocation6], 16384  }
   0xc   :  { %2221 = vsyncadd [#allocation6], 4294950912  ;;  %v2016_v0 = vld [vmem:[#allocation5 + $0x38] sm:$0xff]  ;;  %v2015_v4 = vld [vmem:[#allocation5 + $0x30] sm:$0xff]  ;;  %s1403_s28 = sshll.u32 %s2267_s3, 4  ;;  %s2230_s29 = smov 128   ;;  %s1404_s28 = int_to_ptr.hbm [resolvable:$true] %s1403_s28 }
   0xd   :  { %v2024_v1 = vld [vmem:[#allocation5 + $0x78] sm:$0xff]  ;;  %1171 = vmatpush.bf16.msra.mxu0 %v2016_v0  ;;  %v2023_v5 = vld [vmem:[#allocation5 + $0x70] sm:$0xff]  ;;  %v2014_v8 = vld [vmem:[#allocation5 + $0x28] sm:$0xff]  ;;  %s2231_s30 = smov 8  }
   0xe   :  { %v2032_v2 = vld [vmem:[#allocation5 + $0xb8] sm:$0xff]  ;;  %1185 = vmatpush.bf16.msra.mxu1 %v2024_v1  ;;  %v2031_v6 = vld [vmem:[#allocation5 + $0xb0] sm:$0xff]  ;;  %v2022_v9 = vld [vmem:[#allocation5 + $0x68] sm:$0xff] }
   0xf   :  { %v2040_v3 = vld [vmem:[#allocation5 + $0xf8] sm:$0xff]  ;;  %1199 = vmatpush.bf16.msra.mxu2 %v2032_v2  ;;  %v2039_v7 = vld [vmem:[#allocation5 + $0xf0] sm:$0xff]  ;;  %v2030_v10 = vld [vmem:[#allocation5 + $0xa8] sm:$0xff] }
  0x10   :  { %1213 = vmatpush.bf16.msra.mxu3 %v2040_v3  ;;  %v2038_v11 = vld [vmem:[#allocation5 + $0xe8] sm:$0xff]  ;;  %v2013_v12 = vld [vmem:[#allocation5 + $0x20] sm:$0xff]  ;;  %v2012_v16 = vld [vmem:[#allocation5 + $0x18] sm:$0xff] }
  0x11   :  { %1172 = vmatpush.bf16.msra.mxu0 %v2015_v4  ;;  %v2021_v13 = vld [vmem:[#allocation5 + $0x60] sm:$0xff]  ;;  %v2020_v17 = vld [vmem:[#allocation5 + $0x58] sm:$0xff]  ;;  %v2011_v20 = vld [vmem:[#allocation5 + $0x10] sm:$0xff] }
  0x12   :  { %1186 = vmatpush.bf16.msra.mxu1 %v2023_v5  ;;  %v2029_v14 = vld [vmem:[#allocation5 + $0xa0] sm:$0xff]  ;;  %v2028_v18 = vld [vmem:[#allocation5 + $0x98] sm:$0xff]  ;;  %v2019_v21 = vld [vmem:[#allocation5 + $0x50] sm:$0xff] }
  0x13   :  { %1200 = vmatpush.bf16.msra.mxu2 %v2031_v6  ;;  %v2037_v15 = vld [vmem:[#allocation5 + $0xe0] sm:$0xff]  ;;  %v2036_v19 = vld [vmem:[#allocation5 + $0xd8] sm:$0xff]  ;;  %v2027_v22 = vld [vmem:[#allocation5 + $0x90] sm:$0xff] }
  0x14   :  { %1214 = vmatpush.bf16.msra.mxu3 %v2039_v7  ;;  %v2035_v23 = vld [vmem:[#allocation5 + $0xd0] sm:$0xff]  ;;  %v2010_v24 = vld [vmem:[#allocation5 + $0x8] sm:$0xff]  ;;  %v2009_v28 = vld [vmem:[#allocation5] sm:$0xff] }
  0x15   :  { %1173 = vmatpush.bf16.msra.mxu0 %v2014_v8  ;;  %v2018_v25 = vld [vmem:[#allocation5 + $0x48] sm:$0xff]  ;;  %v2017_v29 = vld [vmem:[#allocation5 + $0x40] sm:$0xff]  ;;  %v2048_v32 = vld [vmem:[#allocation5 + $0x138] sm:$0xff] }
  0x16   :  { %1187 = vmatpush.bf16.msra.mxu1 %v2022_v9  ;;  %v2026_v26 = vld [vmem:[#allocation5 + $0x88] sm:$0xff]  ;;  %v2025_v30 = vld [vmem:[#allocation5 + $0x80] sm:$0xff]  ;;  %v2056_v33 = vld [vmem:[#allocation5 + $0x178] sm:$0xff] }
  0x17   :  { %1201 = vmatpush.bf16.msra.mxu2 %v2030_v10  ;;  %v2034_v27 = vld [vmem:[#allocation5 + $0xc8] sm:$0xff]  ;;  %v2033_v31 = vld [vmem:[#allocation5 + $0xc0] sm:$0xff]  ;;  %v2064_v42 = vld [vmem:[#allocation5 + $0x1b8] sm:$0xff] }
  0x18   :  { %1215 = vmatpush.bf16.msra.mxu3 %v2038_v11  ;;  %v1419_v34 = vld [vmem:[#allocation2] sm:$0xf]  ;;  %v1427_v36 = vld [vmem:[#allocation2 + $0x8] sm:$0xf]  ;;  %v1993_v38 = vld [vmem:[#allocation2 + $0x4] sm:$0xf] }
  0x19   :  { %1174 = vmatpush.bf16.msra.mxu0 %v2013_v12  ;;  %v2001_v35 = vld [vmem:[#allocation2 + $0x3c] sm:$0xf0]  ;;  %v2002_v37 = vld [vmem:[#allocation2 + $0x44] sm:$0xf0]  ;;  %v1421_v39 = vld [vmem:[#allocation2 + $0x40] sm:$0xf0] }
  0x1a   :  { %1188 = vmatpush.bf16.msra.mxu1 %v2021_v13  ;;  %v1994_v40 = vld [vmem:[#allocation2 + $0xc] sm:$0xf]  ;;  %v2072_v43 = vld [vmem:[#allocation5 + $0x1f8] sm:$0xff]  ;;  %v1420_v44 = vor.u32 %v2001_v35, %v1419_v34  ;;  %v1428_v45 = vor.u32 %v2002_v37, %v1427_v36  ;;  %v1424_v46 = vor.u32 %v1993_v38, %v1421_v39  ;;  %v2047_v48 = vld [vmem:[#allocation5 + $0x130] sm:$0xff] }
  0x1b   :  { %1202 = vmatpush.bf16.msra.mxu2 %v2029_v14  ;;  %v1429_v41 = vld [vmem:[#allocation2 + $0x48] sm:$0xf0]  ;;  %v2055_v49 = vld [vmem:[#allocation5 + $0x170] sm:$0xff]  ;;  %v2045_v56 = vld [vmem:[#allocation5 + $0x120] sm:$0xff] }
  0x1c   :  { %1216 = vmatpush.bf16.msra.mxu3 %v2037_v15  ;;  %v1432_v47 = vor.u32 %v1994_v40, %v1429_v41  ;;  %v2063_v50 = vld [vmem:[#allocation5 + $0x1b0] sm:$0xff]  ;;  %v2046_v52 = vld [vmem:[#allocation5 + $0x128] sm:$0xff]  ;;  %v2053_v57 = vld [vmem:[#allocation5 + $0x160] sm:$0xff] }
  0x1d   :  { %1175 = vmatpush.bf16.msra.mxu0 %v2012_v16  ;;  %v2071_v51 = vld [vmem:[#allocation5 + $0x1f0] sm:$0xff]  ;;  %v2054_v53 = vld [vmem:[#allocation5 + $0x168] sm:$0xff]  ;;  %v2061_v58 = vld [vmem:[#allocation5 + $0x1a0] sm:$0xff] }
  0x1e   :  { %1189 = vmatpush.bf16.msra.mxu1 %v2020_v17  ;;  %v2062_v54 = vld [vmem:[#allocation5 + $0x1a8] sm:$0xff]  ;;  %v2069_v59 = vld [vmem:[#allocation5 + $0x1e0] sm:$0xff]  ;;  %v2044_v60 = vld [vmem:[#allocation5 + $0x118] sm:$0xff] }
  0x1f   :  { %1203 = vmatpush.bf16.msra.mxu2 %v2028_v18  ;;  %v2070_v55 = vld [vmem:[#allocation5 + $0x1e8] sm:$0xff]  ;;  %v2052_v61 = vld [vmem:[#allocation5 + $0x158] sm:$0xff]  ;;  %v2043_v0 = vld [vmem:[#allocation5 + $0x110] sm:$0xff] }
  0x20   :  { %1217 = vmatpush.bf16.msra.mxu3 %v2036_v19  ;;  %v2060_v62 = vld [vmem:[#allocation5 + $0x198] sm:$0xff]  ;;  %v2051_v1 = vld [vmem:[#allocation5 + $0x150] sm:$0xff]  ;;  %v2042_v4 = vld [vmem:[#allocation5 + $0x108] sm:$0xff] }
  0x21   :  { %1176 = vmatpush.bf16.msra.mxu0 %v2011_v20  ;;  %v2068_v63 = vld [vmem:[#allocation5 + $0x1d8] sm:$0xff]  ;;  %v2059_v2 = vld [vmem:[#allocation5 + $0x190] sm:$0xff]  ;;  %v2050_v5 = vld [vmem:[#allocation5 + $0x148] sm:$0xff] }
  0x22   :  { %1190 = vmatpush.bf16.msra.mxu1 %v2019_v21  ;;  %v2067_v3 = vld [vmem:[#allocation5 + $0x1d0] sm:$0xff]  ;;  %v2058_v6 = vld [vmem:[#allocation5 + $0x188] sm:$0xff]  ;;  %v2041_v8 = vld [vmem:[#allocation5 + $0x100] sm:$0xff] }
  0x23   :  { %1204 = vmatpush.bf16.msra.mxu2 %v2027_v22  ;;  %v2066_v7 = vld [vmem:[#allocation5 + $0x1c8] sm:$0xff]  ;;  %v2049_v9 = vld [vmem:[#allocation5 + $0x140] sm:$0xff]  ;;  %v2080_v12 = vld [vmem:[#allocation5 + $0x238] sm:$0xff] }
  0x24   :  { %1218 = vmatpush.bf16.msra.mxu3 %v2035_v23  ;;  %v2057_v10 = vld [vmem:[#allocation5 + $0x180] sm:$0xff]  ;;  %v2088_v13 = vld [vmem:[#allocation5 + $0x278] sm:$0xff]  ;;  %v1435_v14 = vld [vmem:[#allocation2 + $0x10] sm:$0xf] }
  0x25   :  { %1177 = vmatpush.bf16.msra.mxu0 %v2010_v24  ;;  %v2065_v11 = vld [vmem:[#allocation5 + $0x1c0] sm:$0xff]  ;;  %v2003_v15 = vld [vmem:[#allocation2 + $0x4c] sm:$0xf0]  ;;  %v1443_v16 = vld [vmem:[#allocation2 + $0x18] sm:$0xf] }
  0x26   :  { %1191 = vmatpush.bf16.msra.mxu1 %v2018_v25  ;;  %v2004_v17 = vld [vmem:[#allocation2 + $0x54] sm:$0xf0]  ;;  %v1995_v18 = vld [vmem:[#allocation2 + $0x14] sm:$0xf]  ;;  %v1996_v20 = vld [vmem:[#allocation2 + $0x1c] sm:$0xf]  ;;  %v1436_v24 = vor.u32 %v2003_v15, %v1435_v14 }
  0x27   :  { %1205 = vmatpush.bf16.msra.mxu2 %v2026_v26  ;;  %v1437_v19 = vld [vmem:[#allocation2 + $0x50] sm:$0xf0]  ;;  %v1445_v21 = vld [vmem:[#allocation2 + $0x58] sm:$0xf0]  ;;  %v1444_v25 = vor.u32 %v2004_v17, %v1443_v16  ;;  %v2094_v34 = vld [vmem:[#allocation5 + $0x2a8] sm:$0xff] }
  0x28   :  { %1219 = vmatpush.bf16.msra.mxu3 %v2034_v27  ;;  %v2096_v22 = vld [vmem:[#allocation5 + $0x2b8] sm:$0xff]  ;;  %v1440_v26 = vor.u32 %v1995_v18, %v1437_v19  ;;  %v1448_v27 = vor.u32 %v1996_v20, %v1445_v21  ;;  %v2102_v35 = vld [vmem:[#allocation5 + $0x2e8] sm:$0xff]  ;;  %v2077_v36 = vld [vmem:[#allocation5 + $0x220] sm:$0xff] }
  0x29   :  { %1178 = vmatpush.bf16.msra.mxu0 %v2009_v28  ;;  %v2104_v23 = vld [vmem:[#allocation5 + $0x2f8] sm:$0xff]  ;;  %v2079_v28 = vld [vmem:[#allocation5 + $0x230] sm:$0xff]  ;;  %v2085_v37 = vld [vmem:[#allocation5 + $0x260] sm:$0xff] }
  0x2a   :  { %1192 = vmatpush.bf16.msra.mxu1 %v2017_v29  ;;  %v2087_v29 = vld [vmem:[#allocation5 + $0x270] sm:$0xff]  ;;  %v2093_v38 = vld [vmem:[#allocation5 + $0x2a0] sm:$0xff]  ;;  %v2076_v40 = vld [vmem:[#allocation5 + $0x218] sm:$0xff] }
  0x2b   :  { %1206 = vmatpush.bf16.msra.mxu2 %v2025_v30  ;;  %v2095_v30 = vld [vmem:[#allocation5 + $0x2b0] sm:$0xff]  ;;  %v2101_v39 = vld [vmem:[#allocation5 + $0x2e0] sm:$0xff]  ;;  %v2084_v41 = vld [vmem:[#allocation5 + $0x258] sm:$0xff] }
  0x2c   :  { %1220 = vmatpush.bf16.msra.mxu3 %v2033_v31  ;;  %1179 = vmatmul.bf16.vlgmr.msra.gmra.mxu0 %v1420_v44  ;;  %v2103_v31 = vld [vmem:[#allocation5 + $0x2f0] sm:$0xff]  ;;  %v2126_v14 = vld [vmem:[#allocation5 + $0x3a8] sm:$0xff]  ;;  %v2109_v16 = vld [vmem:[#allocation5 + $0x320] sm:$0xff] }
  0x2d   :  { %1227 = vmatpush.bf16.msrb.mxu0 %v2048_v32  ;;  %1193 = vmatmul.bf16.vlgmr.msra.gmra.mxu1 %v1424_v46  ;;  %v2078_v32 = vld [vmem:[#allocation5 + $0x228] sm:$0xff]  ;;  %v2075_v44 = vld [vmem:[#allocation5 + $0x210] sm:$0xff]  ;;  %v2117_v17 = vld [vmem:[#allocation5 + $0x360] sm:$0xff] }
  0x2e   :  { %1241 = vmatpush.bf16.msrb.mxu1 %v2056_v33  ;;  %1207 = vmatmul.bf16.vlgmr.msra.gmra.mxu2 %v1428_v45  ;;  %v2086_v33 = vld [vmem:[#allocation5 + $0x268] sm:$0xff]  ;;  %v2083_v45 = vld [vmem:[#allocation5 + $0x250] sm:$0xff]  ;;  %v2125_v18 = vld [vmem:[#allocation5 + $0x3a0] sm:$0xff] }
  0x2f   :  { %1255 = vmatpush.bf16.msrb.mxu2 %v2064_v42  ;;  %1221 = vmatmul.bf16.vlgmr.msra.gmra.mxu3 %v1432_v47  ;;  %v2092_v42 = vld [vmem:[#allocation5 + $0x298] sm:$0xff]  ;;  %v2091_v46 = vld [vmem:[#allocation5 + $0x290] sm:$0xff]  ;;  %v2134_v15 = vld [vmem:[#allocation5 + $0x3e8] sm:$0xff] }
  0x30   :  { %1269 = vmatpush.bf16.msrb.mxu3 %v2072_v43  ;;  %v2100_v43 = vld [vmem:[#allocation5 + $0x2d8] sm:$0xff]  ;;  %v2099_v47 = vld [vmem:[#allocation5 + $0x2d0] sm:$0xff]  ;;  %v2133_v19 = vld [vmem:[#allocation5 + $0x3e0] sm:$0xff] }
  0x31   :  { %1228 = vmatpush.bf16.msrb.mxu0 %v2047_v48  ;;  %v2074_v48 = vld [vmem:[#allocation5 + $0x208] sm:$0xff]  ;;  %v2108_v20 = vld [vmem:[#allocation5 + $0x318] sm:$0xff] }
  0x32   :  { %1242 = vmatpush.bf16.msrb.mxu1 %v2055_v49  ;;  %v2082_v49 = vld [vmem:[#allocation5 + $0x248] sm:$0xff]  ;;  %v2116_v21 = vld [vmem:[#allocation5 + $0x358] sm:$0xff] }
  0x33   :  { %1256 = vmatpush.bf16.msrb.mxu2 %v2063_v50  ;;  %v2090_v50 = vld [vmem:[#allocation5 + $0x288] sm:$0xff] }
  0x34   :  { %1270 = vmatpush.bf16.msrb.mxu3 %v2071_v51  ;;  %v2098_v51 = vld [vmem:[#allocation5 + $0x2c8] sm:$0xff] }
  0x35   :  { %1229 = vmatpush.bf16.msrb.mxu0 %v2046_v52  ;;  %v2073_v52 = vld [vmem:[#allocation5 + $0x200] sm:$0xff] }
  0x36   :  { %1243 = vmatpush.bf16.msrb.mxu1 %v2054_v53  ;;  %v2081_v53 = vld [vmem:[#allocation5 + $0x240] sm:$0xff] }
  0x37   :  { %1257 = vmatpush.bf16.msrb.mxu2 %v2062_v54  ;;  %v2089_v54 = vld [vmem:[#allocation5 + $0x280] sm:$0xff] }
  0x38   :  { %1271 = vmatpush.bf16.msrb.mxu3 %v2070_v55  ;;  %v2097_v55 = vld [vmem:[#allocation5 + $0x2c0] sm:$0xff] }
  0x39   :  { %1230 = vmatpush.bf16.msrb.mxu0 %v2045_v56  ;;  %v2112_v56 = vld [vmem:[#allocation5 + $0x338] sm:$0xff] }
  0x3a   :  { %1244 = vmatpush.bf16.msrb.mxu1 %v2053_v57  ;;  %v2120_v57 = vld [vmem:[#allocation5 + $0x378] sm:$0xff] }
  0x3b   :  { %1258 = vmatpush.bf16.msrb.mxu2 %v2061_v58  ;;  %v1451_v58 = vld [vmem:[#allocation2 + $0x20] sm:$0xf] }
  0x3c   :  { %1272 = vmatpush.bf16.msrb.mxu3 %v2069_v59  ;;  %v2005_v59 = vld [vmem:[#allocation2 + $0x5c] sm:$0xf0] }
  0x3d   :  { %1231 = vmatpush.bf16.msrb.mxu0 %v2044_v60  ;;  %v1459_v60 = vld [vmem:[#allocation2 + $0x28] sm:$0xf] }
  0x3e   :  { %1245 = vmatpush.bf16.msrb.mxu1 %v2052_v61  ;;  %v2006_v61 = vld [vmem:[#allocation2 + $0x64] sm:$0xf0] }
  0x3f   :  { %1259 = vmatpush.bf16.msrb.mxu2 %v2060_v62  ;;  %v1997_v62 = vld [vmem:[#allocation2 + $0x24] sm:$0xf] }
  0x40   :  { %1273 = vmatpush.bf16.msrb.mxu3 %v2068_v63  ;;  %v1453_v63 = vld [vmem:[#allocation2 + $0x60] sm:$0xf0] }
  0x41   :  { %1232 = vmatpush.bf16.msrb.mxu0 %v2043_v0  ;;  %v1998_v0 = vld [vmem:[#allocation2 + $0x2c] sm:$0xf] }
  0x42   :  { %1246 = vmatpush.bf16.msrb.mxu1 %v2051_v1  ;;  %v1461_v1 = vld [vmem:[#allocation2 + $0x68] sm:$0xf0] }
  0x43   :  { %1260 = vmatpush.bf16.msrb.mxu2 %v2059_v2  ;;  %v2128_v2 = vld [vmem:[#allocation5 + $0x3b8] sm:$0xff] }
  0x44   :  { %1274 = vmatpush.bf16.msrb.mxu3 %v2067_v3  ;;  %v2136_v3 = vld [vmem:[#allocation5 + $0x3f8] sm:$0xff] }
  0x45   :  { %1233 = vmatpush.bf16.msrb.mxu0 %v2042_v4  ;;  %v1452_v4 = vor.u32 %v2005_v59, %v1451_v58 }
  0x46   :  { %1247 = vmatpush.bf16.msrb.mxu1 %v2050_v5  ;;  %v1460_v5 = vor.u32 %v2006_v61, %v1459_v60 }
  0x47   :  { %1261 = vmatpush.bf16.msrb.mxu2 %v2058_v6  ;;  %v1456_v6 = vor.u32 %v1997_v62, %v1453_v63 }
  0x48   :  { %1275 = vmatpush.bf16.msrb.mxu3 %v2066_v7  ;;  %v1464_v7 = vor.u32 %v1998_v0, %v1461_v1 }
  0x49   :  { %1234 = vmatpush.bf16.msrb.mxu0 %v2041_v8  ;;  %v2111_v8 = vld [vmem:[#allocation5 + $0x330] sm:$0xff] }
  0x4a   :  { %1248 = vmatpush.bf16.msrb.mxu1 %v2049_v9  ;;  %v2119_v9 = vld [vmem:[#allocation5 + $0x370] sm:$0xff] }
  0x4b   :  { %1262 = vmatpush.bf16.msrb.mxu2 %v2057_v10  ;;  %v2127_v10 = vld [vmem:[#allocation5 + $0x3b0] sm:$0xff] }
  0x4c   :  { %1276 = vmatpush.bf16.msrb.mxu3 %v2065_v11  ;;  %1235 = vmatmul.bf16.vlgmr.msrb.gmra.mxu0 %v1436_v24  ;;  %v2135_v11 = vld [vmem:[#allocation5 + $0x3f0] sm:$0xff] }
  0x4d   :  { %1283 = vmatpush.bf16.msra.mxu0 %v2080_v12  ;;  %1249 = vmatmul.bf16.vlgmr.msrb.gmra.mxu1 %v1440_v26  ;;  %v2110_v12 = vld [vmem:[#allocation5 + $0x328] sm:$0xff]  ;;  %v2107_v24 = vld [vmem:[#allocation5 + $0x310] sm:$0xff] }
  0x4e   :  { %1297 = vmatpush.bf16.msra.mxu1 %v2088_v13  ;;  %1263 = vmatmul.bf16.vlgmr.msrb.gmra.mxu2 %v1444_v25  ;;  %v2118_v13 = vld [vmem:[#allocation5 + $0x368] sm:$0xff]  ;;  %v2115_v25 = vld [vmem:[#allocation5 + $0x350] sm:$0xff] }
  0x4f   :  { %1311 = vmatpush.bf16.msra.mxu2 %v2096_v22  ;;  %1277 = vmatmul.bf16.vlgmr.msrb.gmra.mxu3 %v1448_v27  ;;  %v2124_v22 = vld [vmem:[#allocation5 + $0x398] sm:$0xff]  ;;  %v2123_v26 = vld [vmem:[#allocation5 + $0x390] sm:$0xff] }
  0x50   :  { %1325 = vmatpush.bf16.msra.mxu3 %v2104_v23  ;;  %v2132_v23 = vld [vmem:[#allocation5 + $0x3d8] sm:$0xff]  ;;  %v2131_v27 = vld [vmem:[#allocation5 + $0x3d0] sm:$0xff] }
  0x51   :  { %1284 = vmatpush.bf16.msra.mxu0 %v2079_v28  ;;  %v2106_v28 = vld [vmem:[#allocation5 + $0x308] sm:$0xff] }
  0x52   :  { %1298 = vmatpush.bf16.msra.mxu1 %v2087_v29  ;;  %v2114_v29 = vld [vmem:[#allocation5 + $0x348] sm:$0xff] }
  0x53   :  { %1312 = vmatpush.bf16.msra.mxu2 %v2095_v30  ;;  %v2122_v30 = vld [vmem:[#allocation5 + $0x388] sm:$0xff] }
  0x54   :  { %1326 = vmatpush.bf16.msra.mxu3 %v2103_v31  ;;  %v2130_v31 = vld [vmem:[#allocation5 + $0x3c8] sm:$0xff] }
  0x55   :  { %1285 = vmatpush.bf16.msra.mxu0 %v2078_v32  ;;  %v2105_v32 = vld [vmem:[#allocation5 + $0x300] sm:$0xff] }
  0x56   :  { %1299 = vmatpush.bf16.msra.mxu1 %v2086_v33  ;;  %v2113_v33 = vld [vmem:[#allocation5 + $0x340] sm:$0xff] }
  0x57   :  { %1313 = vmatpush.bf16.msra.mxu2 %v2094_v34  ;;  %v2121_v34 = vld [vmem:[#allocation5 + $0x380] sm:$0xff] }
  0x58   :  { %1327 = vmatpush.bf16.msra.mxu3 %v2102_v35  ;;  %v2129_v35 = vld [vmem:[#allocation5 + $0x3c0] sm:$0xff] }
  0x59   :  { %1286 = vmatpush.bf16.msra.mxu0 %v2077_v36  ;;  %v1467_v36 = vld [vmem:[#allocation2 + $0x30] sm:$0xf] }
  0x5a   :  { %1300 = vmatpush.bf16.msra.mxu1 %v2085_v37  ;;  %v2007_v37 = vld [vmem:[#allocation2 + $0x6c] sm:$0xf0] }
  0x5b   :  { %1314 = vmatpush.bf16.msra.mxu2 %v2093_v38  ;;  %v1999_v38 = vld [vmem:[#allocation2 + $0x34] sm:$0xf] }
  0x5c   :  { %1328 = vmatpush.bf16.msra.mxu3 %v2101_v39  ;;  %v1469_v39 = vld [vmem:[#allocation2 + $0x70] sm:$0xf0] }
  0x5d   :  { %1287 = vmatpush.bf16.msra.mxu0 %v2076_v40  ;;  %v1475_v40 = vld [vmem:[#allocation2 + $0x38] sm:$0xf] }
  0x5e   :  { %1301 = vmatpush.bf16.msra.mxu1 %v2084_v41  ;;  %v2008_v41 = vld [vmem:[#allocation2 + $0x74] sm:$0xf0] }
  0x5f   :  { %1315 = vmatpush.bf16.msra.mxu2 %v2092_v42  ;;  %v2000_v42 = vld [vmem:[#allocation2 + $0x3c] sm:$0xf] }
  0x60   :  { %1329 = vmatpush.bf16.msra.mxu3 %v2100_v43  ;;  %v1477_v43 = vld [vmem:[#allocation2 + $0x78] sm:$0xf0] }
  0x61   :  { %1288 = vmatpush.bf16.msra.mxu0 %v2075_v44  ;;  %v1468_v44 = vor.u32 %v2007_v37, %v1467_v36 }
  0x62   :  { %1302 = vmatpush.bf16.msra.mxu1 %v2083_v45  ;;  %v1472_v45 = vor.u32 %v1999_v38, %v1469_v39 }
  0x63   :  { %1316 = vmatpush.bf16.msra.mxu2 %v2091_v46  ;;  %v1476_v46 = vor.u32 %v2008_v41, %v1475_v40 }
  0x64   :  { %1330 = vmatpush.bf16.msra.mxu3 %v2099_v47  ;;  %v1480_v47 = vor.u32 %v2000_v42, %v1477_v43 }
  0x65   :  { %1289 = vmatpush.bf16.msra.mxu0 %v2074_v48 }
  0x66   :  { %1303 = vmatpush.bf16.msra.mxu1 %v2082_v49 }
  0x67   :  { %1317 = vmatpush.bf16.msra.mxu2 %v2090_v50 }
  0x68   :  { %1331 = vmatpush.bf16.msra.mxu3 %v2098_v51 }
  0x69   :  { %1290 = vmatpush.bf16.msra.mxu0 %v2073_v52 }
  0x6a   :  { %1304 = vmatpush.bf16.msra.mxu1 %v2081_v53  ;;  %v2145_v53 = vld [vmem:[%s2266_s2] ss:$0 sm:$0xff]  ;;  %s2229_s2 = smov [#allocation7]  }
  0x6b   :  { %1318 = vmatpush.bf16.msra.mxu2 %v2089_v54  ;;  %s1401_s25 = sshll.u32 %s2229_s2, 4  ;;  %s1402_s25 = int_to_ptr.vmem [resolvable:$true] %s1401_s25 }
  0x6c   :  { %1332 = vmatpush.bf16.msra.mxu3 %v2097_v55  ;;  %1291 = vmatmul.bf16.vlgmr.msra.gmra.mxu0 %v1452_v4 }
  0x6d   :  { %1339 = vmatpush.bf16.msrb.mxu0 %v2112_v56  ;;  %1305 = vmatmul.bf16.vlgmr.msra.gmra.mxu1 %v1456_v6 }
  0x6e   :  { %1353 = vmatpush.bf16.msrb.mxu1 %v2120_v57  ;;  %1319 = vmatmul.bf16.vlgmr.msra.gmra.mxu2 %v1460_v5 }
  0x6f   :  { %1367 = vmatpush.bf16.msrb.mxu2 %v2128_v2  ;;  %1333 = vmatmul.bf16.vlgmr.msra.gmra.mxu3 %v1464_v7 }
  0x70   :  { %1381 = vmatpush.bf16.msrb.mxu3 %v2136_v3 }
  0x71   :  { %1340 = vmatpush.bf16.msrb.mxu0 %v2111_v8 }
  0x72   :  { %1354 = vmatpush.bf16.msrb.mxu1 %v2119_v9 }
  0x73   :  { %1368 = vmatpush.bf16.msrb.mxu2 %v2127_v10 }
  0x74   :  { %1382 = vmatpush.bf16.msrb.mxu3 %v2135_v11 }
  0x75   :  { %1341 = vmatpush.bf16.msrb.mxu0 %v2110_v12 }
  0x76   :  { %1355 = vmatpush.bf16.msrb.mxu1 %v2118_v13 }
  0x77   :  { %1369 = vmatpush.bf16.msrb.mxu2 %v2126_v14 }
  0x78   :  { %1383 = vmatpush.bf16.msrb.mxu3 %v2134_v15 }
  0x79   :  { %1342 = vmatpush.bf16.msrb.mxu0 %v2109_v16 }
  0x7a   :  { %1356 = vmatpush.bf16.msrb.mxu1 %v2117_v17 }
  0x7b   :  { %1370 = vmatpush.bf16.msrb.mxu2 %v2125_v18 }
  0x7c   :  { %1384 = vmatpush.bf16.msrb.mxu3 %v2133_v19 }
  0x7d   :  { %1343 = vmatpush.bf16.msrb.mxu0 %v2108_v20 }
  0x7e   :  { %1357 = vmatpush.bf16.msrb.mxu1 %v2116_v21 }
  0x7f   :  { %1371 = vmatpush.bf16.msrb.mxu2 %v2124_v22 }
  0x80   :  { %1385 = vmatpush.bf16.msrb.mxu3 %v2132_v23 }
  0x81   :  { %1344 = vmatpush.bf16.msrb.mxu0 %v2107_v24 }
  0x82   :  { %1358 = vmatpush.bf16.msrb.mxu1 %v2115_v25 }
  0x83   :  { %1372 = vmatpush.bf16.msrb.mxu2 %v2123_v26 }
  0x84   :  { %1386 = vmatpush.bf16.msrb.mxu3 %v2131_v27 }
  0x85   :  { %1345 = vmatpush.bf16.msrb.mxu0 %v2106_v28 }
  0x86   :  { %1359 = vmatpush.bf16.msrb.mxu1 %v2114_v29 }
  0x87   :  { %1373 = vmatpush.bf16.msrb.mxu2 %v2122_v30 }
  0x88   :  { %1387 = vmatpush.bf16.msrb.mxu3 %v2130_v31 }
  0x89   :  { %1346 = vmatpush.bf16.msrb.mxu0 %v2105_v32 }
  0x8a   :  { %1360 = vmatpush.bf16.msrb.mxu1 %v2113_v33 }
  0x8b   :  { %1374 = vmatpush.bf16.msrb.mxu2 %v2121_v34 }
  0x8c   :  { %1388 = vmatpush.bf16.msrb.mxu3 %v2129_v35  ;;  %1347 = vmatmul.bf16.vlgmr.msrb.gmra.mxu0 %v1468_v44 }
  0x8d   :  { %1361 = vmatmul.bf16.vlgmr.msrb.gmra.mxu1 %v1472_v45 }
  0x8e   :  { %1375 = vmatmul.bf16.vlgmr.msrb.gmra.mxu2 %v1476_v46 }
  0x8f   :  { %1389 = vmatmul.bf16.vlgmr.msrb.gmra.mxu3 %v1480_v47 }
  0xa9   :  { %v1180_v48 = vpop.f32.mrf.mxu0 }
  0xaa   :  { %v1194_v49 = vpop.f32.mrf.mxu1  ;;  %v1181_v55 = vadd.f32 %v2145_v53, %v1180_v48 }
  0xac   :  { %v1195_v58 = vadd.f32 %v1194_v49, %v1181_v55 }
  0xb1   :  { %v1208_v50 = vpop.f32.mrf.mxu2  ;;  %v1182_v52 = vpop.f32.mrf.mxu0 }
  0xb2   :  { %v1222_v51 = vpop.f32.mrf.mxu3  ;;  %v1196_v54 = vpop.f32.mrf.mxu1  ;;  %v1209_v61 = vadd.f32 %v1208_v50, %v1195_v58  ;;  %v1183_v62 = vadd.f32 %v2145_v53, %v1182_v52 }
  0xb4   :  { %v1223_v1 = vadd.f32 %v1222_v51, %v1209_v61  ;;  %v1197_v2 = vadd.f32 %v1196_v54, %v1183_v62 }
  0xb9   :  { %v1210_v56 = vpop.f32.mrf.mxu2 }
  0xba   :  { %v1224_v57 = vpop.f32.mrf.mxu3  ;;  %v1211_v6 = vadd.f32 %v1210_v56, %v1197_v2 }
  0xbc   :  { %v1225_v10 = vadd.f32 %v1224_v57, %v1211_v6 }
  0xc9   :  { %v1236_v59 = vpop.f32.mrf.mxu0 }
  0xca   :  { %v1250_v60 = vpop.f32.mrf.mxu1  ;;  %v1237_v4 = vadd.f32 %v1236_v59, %v1223_v1 }
  0xcc   :  { %v1251_v7 = vadd.f32 %v1250_v60, %v1237_v4 }
  0xd1   :  { %v1264_v63 = vpop.f32.mrf.mxu2  ;;  %v1238_v3 = vpop.f32.mrf.mxu0 }
  0xd2   :  { %v1278_v0 = vpop.f32.mrf.mxu3  ;;  %v1252_v5 = vpop.f32.mrf.mxu1  ;;  %v1265_v12 = vadd.f32 %v1264_v63, %v1251_v7  ;;  %v1239_v14 = vadd.f32 %v1238_v3, %v1225_v10 }
  0xd4   :  { %v1279_v15 = vadd.f32 %v1278_v0, %v1265_v12  ;;  %v1253_v18 = vadd.f32 %v1252_v5, %v1239_v14 }
  0xd9   :  { %v1266_v8 = vpop.f32.mrf.mxu2 }
  0xda   :  { %v1280_v9 = vpop.f32.mrf.mxu3  ;;  %v1267_v20 = vadd.f32 %v1266_v8, %v1253_v18 }
  0xdc   :  { %v1281_v24 = vadd.f32 %v1280_v9, %v1267_v20 }
  0xe9   :  { %v1292_v11 = vpop.f32.mrf.mxu0 }
  0xea   :  { %v1306_v13 = vpop.f32.mrf.mxu1  ;;  %v1293_v19 = vadd.f32 %v1292_v11, %v1279_v15 }
  0xec   :  { %v1307_v22 = vadd.f32 %v1306_v13, %v1293_v19 }
  0xf1   :  { %v1320_v16 = vpop.f32.mrf.mxu2  ;;  %v1294_v21 = vpop.f32.mrf.mxu0 }
  0xf2   :  { %v1334_v17 = vpop.f32.mrf.mxu3  ;;  %v1308_v23 = vpop.f32.mrf.mxu1  ;;  %v1321_v25 = vadd.f32 %v1320_v16, %v1307_v22  ;;  %v1295_v26 = vadd.f32 %v1294_v21, %v1281_v24 }
  0xf4   :  { %v1335_v29 = vadd.f32 %v1334_v17, %v1321_v25  ;;  %v1309_v31 = vadd.f32 %v1308_v23, %v1295_v26 }
  0xf9   :  { %v1322_v27 = vpop.f32.mrf.mxu2 }
  0xfa   :  { %v1336_v28 = vpop.f32.mrf.mxu3  ;;  %v1323_v34 = vadd.f32 %v1322_v27, %v1309_v31 }
  0xfc   :  { %v1337_v38 = vadd.f32 %v1336_v28, %v1323_v34 }
 0x109   :  { %v1348_v30 = vpop.f32.mrf.mxu0 }
 0x10a   :  { %v1349_v32 = vadd.f32 %v1348_v30, %v1335_v29  ;;  %v1362_v33 = vpop.f32.mrf.mxu1 }
 0x10c   :  { %v1363_v35 = vadd.f32 %v1362_v33, %v1349_v32 }
 0x111   :  { %v1376_v36 = vpop.f32.mrf.mxu2  ;;  %v1350_v40 = vpop.f32.mrf.mxu0 }
 0x112   :  { %v1390_v37 = vpop.f32.mrf.mxu3  ;;  %v1377_v39 = vadd.f32 %v1376_v36, %v1363_v35  ;;  %v1351_v42 = vadd.f32 %v1350_v40, %v1337_v38  ;;  %v1364_v43 = vpop.f32.mrf.mxu1 }
 0x114   :  { %v1391_v41 = vadd.f32 %v1390_v37, %v1377_v39  ;;  %v1365_v44 = vadd.f32 %v1364_v43, %v1351_v42 }
 0x116   :  { %1395 = vst [vmem:[#allocation7] sm:$0xff] %v1391_v41 }
 0x119   :  { %v1378_v45 = vpop.f32.mrf.mxu2 }
 0x11a   :  { %v1379_v46 = vadd.f32 %v1378_v45, %v1365_v44  ;;  %v1392_v47 = vpop.f32.mrf.mxu3 }
 0x11c   :  { %v1393_v48 = vadd.f32 %v1392_v47, %v1379_v46 }
 0x11e   :  { %1396 = vst [vmem:[#allocation7 + $0x8] sm:$0xff] %v1393_v48 }
 0x11f   :  { %1409 = dma.vmem_to_hbm [thread:$0]  %s1402_s25, 256, %s1404_s28, [#allocation4], %s2230_s29, %s2230_s29, %s2231_s30  }
 0x120   :  { %2222 = dma.done.wait [#allocation4], 256  }
 0x121   :  { %2223 = vsyncadd [#allocation4], 4294967040 }
 0x122   :  { %1414 = vsyncpa [#allocation3], 1 }
 0x123   :  { %1415 = vsyncpa [#allocation6], 1 }
 0x124   :  { %1416 = vsyncpa [#allocation4], 1 }

</bundles_post_ra>
